<compile_context>
chip_gen: v7x
topology: tpu7x:2x2x1
jax: 0.10.0
libtpu: 0.0.40
codegen_flags: <defaults>
</compile_context>

<pallas_src>
import functools

import jax
import jax.numpy as jnp
from jax.experimental import pallas as pl
from jax.experimental.pallas import tpu as pltpu


def _round_up(n, m):
    return ((n + m - 1) // m) * m


def _policy_kernel(x_ref, w1_ref, b1_ref, w2_ref, b2_ref, logp_ref, *probs_refs):
    # fc1 + ReLU (MXU matmul, f32 accumulation).
    h = jnp.dot(x_ref[...], w1_ref[...], preferred_element_type=jnp.float32)
    h = jnp.maximum(h + b1_ref[...], 0.0)                    # (TB,128)+(1,128)

    # fc2 -> logits over the (unpadded) action axis.
    logits = jnp.dot(h, w2_ref[...], preferred_element_type=jnp.float32)
    logits = logits + b2_ref[...]                            # (TB,A)+(1,A)

    # Numerically-stable log-softmax along the action axis (PyTorch dim=1).
    m = jnp.max(logits, axis=-1, keepdims=True)
    shifted = logits - m
    e = jnp.exp(shifted)
    denom = jnp.sum(e, axis=-1, keepdims=True)
    logp_ref[...] = (shifted - jnp.log(denom)).astype(logp_ref.dtype)

    if probs_refs:  # optional probs output: reuse e/denom, no second exp pass
        probs_refs[0][...] = (e * (1.0 / denom)).astype(probs_refs[0].dtype)


def policy_forward(x, w1, b1, w2, b2, *, block_batch=1024, return_probs=False):
    """Forward pass of the policy net.

    Returns log-probs (batch, n_actions) by default, or (probs, log_probs) if
    `return_probs=True`.  `probs` equals the Categorical's `probs` from the
    PyTorch forward; log_probs is the matching log-softmax.
    """
    B, D = x.shape
    Din, H = w1.shape
    H2, A = w2.shape
    assert Din == D and H2 == H

    # Batch tiling: big tiles amortize per-step overhead, but keep >=2 grid
    # steps whenever possible so v7x can shard the parallel axis over 2 TCs.
    tb = min(_round_up(block_batch, 8), _round_up(pl.cdiv(B, 2), 8))
    tb = max(tb, 8)
    bp = _round_up(B, tb)
    xp = jnp.pad(x, ((0, bp - B), (0, 0))) if bp != B else x
    grid = (bp // tb,)

    out_shape = [jax.ShapeDtypeStruct((bp, A), jnp.float32)]            # logp
    out_specs = [pl.BlockSpec((tb, A), lambda i: (i, 0))]
    if return_probs:
        out_shape.append(jax.ShapeDtypeStruct((bp, A), jnp.float32))    # probs
        out_specs.append(pl.BlockSpec((tb, A), lambda i: (i, 0)))

    outs = pl.pallas_call(
        _policy_kernel,
        out_shape=tuple(out_shape),
        grid=grid,
        in_specs=[
            pl.BlockSpec((tb, D), lambda i: (i, 0)),      # x   (batch-tiled)
            pl.BlockSpec((Din, H), lambda i: (0, 0)),     # w1  (resident)
            pl.BlockSpec((1, H), lambda i: (0, 0)),       # b1  (resident)
            pl.BlockSpec((H, A), lambda i: (0, 0)),       # w2  (resident)
            pl.BlockSpec((1, A), lambda i: (0, 0)),       # b2  (resident)
        ],
        out_specs=tuple(out_specs),
        compiler_params=pltpu.CompilerParams(
            dimension_semantics=("parallel",),            # megacore on v7x
        ),
    )(xp, w1, b1, w2, b2)

    logp = outs[0][:B]
    if return_probs:
        return outs[1][:B], logp
    return logp


def init_params(key, input_size, n_actions, hidden=128):
    """Mimics PyTorch's default Linear init: U[-1/sqrt(fan_in), 1/sqrt(fan_in)]."""
    k1, k2, k3, k4 = jax.random.split(key, 4)
    bound1 = 1.0 / jnp.sqrt(jnp.float32(input_size))
    bound2 = 1.0 / jnp.sqrt(jnp.float32(hidden))
    w1 = jax.random.uniform(k1, (input_size, hidden), jnp.float32, -bound1, bound1)
    b1 = jax.random.uniform(k2, (1, hidden), jnp.float32, -bound1, bound1)
    w2 = jax.random.uniform(k3, (hidden, n_actions), jnp.float32, -bound2, bound2)
    b2 = jax.random.uniform(k4, (1, n_actions), jnp.float32, -bound2, bound2)
    return w1, b1, w2, b2


if __name__ == "__main__":
    key = jax.random.PRNGKey(0)
    k_x, k_p, k_sample = jax.random.split(key, 3)

    batch = 16
    input_size = 8
    n_actions = 4

    x = jax.random.normal(k_x, (batch, input_size), jnp.float32)
    w1, b1, w2, b2 = init_params(k_p, input_size, n_actions)

    # With B=16 the tile cap ceil(B/2)=8 gives grid=(2,), exercising the
    # batch-tiled pipeline even at this tiny test size.
    probs, logp = policy_forward(x, w1, b1, w2, b2, return_probs=True)
    logp_only = policy_forward(x, w1, b1, w2, b2)            # default fast path
    probs, logp, logp_only = jax.block_until_ready((probs, logp, logp_only))

    # Pure-JAX reference of the PyTorch forward.
    h_ref = jnp.maximum(x @ w1 + b1, 0.0)
    logits_ref = h_ref @ w2 + b2
    probs_ref = jax.nn.softmax(logits_ref, axis=1)
    logp_ref = jax.nn.log_softmax(logits_ref, axis=1)

    assert probs.shape == (batch, n_actions)
    assert logp.shape == (batch, n_actions)
    assert logp_only.shape == (batch, n_actions)
    assert jnp.allclose(jnp.sum(probs, axis=-1), 1.0, atol=1e-5)
    assert jnp.allclose(probs, probs_ref, atol=1e-5)
    assert jnp.allclose(logp, logp_ref, atol=1e-5)
    assert jnp.allclose(logp_only, logp_ref, atol=1e-5)

    # Categorical(probs): sampling/log_prob are glue over the kernel outputs.
    actions = jax.random.categorical(k_sample, logp_only, axis=-1)
    actions = jax.block_until_ready(actions)
    assert actions.shape == (batch,)

    print("KERNEL_OK")
</pallas_src>

<mosaic_0001>
module attributes {stable_mosaic.version = 11 : i64} {
  func.func @_policy_kernel(%arg0: i32, %arg1: memref<8x8xf32, #tpu.memory_space<vmem>>, %arg2: memref<8x128xf32, #tpu.memory_space<vmem>>, %arg3: memref<1x128xf32, #tpu.memory_space<vmem>>, %arg4: memref<128x4xf32, #tpu.memory_space<vmem>>, %arg5: memref<1x4xf32, #tpu.memory_space<vmem>>, %arg6: memref<8x4xf32, #tpu.memory_space<vmem>>, %arg7: memref<8x4xf32, #tpu.memory_space<vmem>>) attributes {dimension_semantics = [#tpu.dimension_semantics<parallel>], iteration_bounds = array<i64: 2>, scalar_prefetch = 0 : i64, scratch_operands = 0 : i64, tpu.core_type = #tpu.core_type<tc>, window_params = [{transform_indices = @transform_0, window_bounds = array<i64: 8, 8>}, {pipeline_mode = #tpu.pipeline_mode<synchronous>, transform_indices = @transform_1, window_bounds = array<i64: 8, 128>}, {pipeline_mode = #tpu.pipeline_mode<synchronous>, transform_indices = @transform_2, window_bounds = array<i64: 1, 128>}, {pipeline_mode = #tpu.pipeline_mode<synchronous>, transform_indices = @transform_3, window_bounds = array<i64: 128, 4>}, {pipeline_mode = #tpu.pipeline_mode<synchronous>, transform_indices = @transform_4, window_bounds = array<i64: 1, 4>}, {transform_indices = @transform_5, window_bounds = array<i64: 8, 4>}, {transform_indices = @transform_6, window_bounds = array<i64: 8, 4>}]} {
    %c0 = arith.constant 0 : index
    %c0_0 = arith.constant 0 : index
    %0 = vector.load %arg1[%c0, %c0_0] : memref<8x8xf32, #tpu.memory_space<vmem>>, vector<8x8xf32>
    %c0_1 = arith.constant 0 : index
    %c0_2 = arith.constant 0 : index
    %1 = vector.load %arg2[%c0_1, %c0_2] : memref<8x128xf32, #tpu.memory_space<vmem>>, vector<8x128xf32>
    %cst = arith.constant dense<0.000000e+00> : vector<8x128xf32>
    %2 = tpu.matmul %0, %1, %cst {dimension_numbers = #tpu.dot_dimension_numbers<[1], [0], [0], [1], [0, 0, 1, 1], [], []>} : vector<8x8xf32>, vector<8x128xf32>, vector<8x128xf32> -> vector<8x128xf32>
    %c0_3 = arith.constant 0 : index
    %c0_4 = arith.constant 0 : index
    %3 = vector.load %arg3[%c0_3, %c0_4] : memref<1x128xf32, #tpu.memory_space<vmem>>, vector<1x128xf32>
    %4 = vector.broadcast %3 : vector<1x128xf32> to vector<8x128xf32>
    %5 = arith.addf %2, %4 : vector<8x128xf32>
    %cst_5 = arith.constant 0.000000e+00 : f32
    %6 = vector.broadcast %cst_5 : f32 to vector<8x128xf32>
    %7 = arith.maximumf %5, %6 : vector<8x128xf32>
    %c0_6 = arith.constant 0 : index
    %c0_7 = arith.constant 0 : index
    %8 = vector.load %arg4[%c0_6, %c0_7] : memref<128x4xf32, #tpu.memory_space<vmem>>, vector<128x4xf32>
    %cst_8 = arith.constant dense<0.000000e+00> : vector<8x4xf32>
    %9 = tpu.matmul %7, %8, %cst_8 {dimension_numbers = #tpu.dot_dimension_numbers<[1], [0], [0], [1], [0, 0, 1, 1], [], []>} : vector<8x128xf32>, vector<128x4xf32>, vector<8x4xf32> -> vector<8x4xf32>
    %c0_9 = arith.constant 0 : index
    %c0_10 = arith.constant 0 : index
    %10 = vector.load %arg5[%c0_9, %c0_10] : memref<1x4xf32, #tpu.memory_space<vmem>>, vector<1x4xf32>
    %11 = vector.broadcast %10 : vector<1x4xf32> to vector<8x4xf32>
    %12 = arith.addf %9, %11 : vector<8x4xf32>
    %cst_11 = arith.constant dense<0xFF800000> : vector<8xf32>
    %13 = vector.multi_reduction <maximumf>, %12, %cst_11 [1] : vector<8x4xf32> to vector<8xf32>
    %14 = vector.shape_cast %13 : vector<8xf32> to vector<8x1xf32>
    %15 = vector.broadcast %14 : vector<8x1xf32> to vector<8x4xf32>
    %16 = arith.subf %12, %15 : vector<8x4xf32>
    %17 = math.exp %16 : vector<8x4xf32>
    %cst_12 = arith.constant dense<0.000000e+00> : vector<8xf32>
    %18 = vector.multi_reduction <add>, %17, %cst_12 [1] : vector<8x4xf32> to vector<8xf32>
    %19 = vector.shape_cast %18 : vector<8xf32> to vector<8x1xf32>
    %20 = math.log %19 : vector<8x1xf32>
    %21 = vector.broadcast %20 : vector<8x1xf32> to vector<8x4xf32>
    %22 = arith.subf %16, %21 : vector<8x4xf32>
    %c0_13 = arith.constant 0 : index
    %c0_14 = arith.constant 0 : index
    %23 = vector.load %arg6[%c0_13, %c0_14] : memref<8x4xf32, #tpu.memory_space<vmem>>, vector<8x4xf32>
    tpu.vector_store %arg6[%c0_13, %c0_14], %22 {strides = array<i32>} : memref<8x4xf32, #tpu.memory_space<vmem>>, vector<8x4xf32>,
    %cst_15 = arith.constant 1.000000e+00 : f32
    %24 = vector.broadcast %cst_15 : f32 to vector<8x1xf32>
    %25 = arith.divf %24, %19 : vector<8x1xf32>
    %26 = vector.broadcast %25 : vector<8x1xf32> to vector<8x4xf32>
    %27 = arith.mulf %17, %26 : vector<8x4xf32>
    %c0_16 = arith.constant 0 : index
    %c0_17 = arith.constant 0 : index
    %28 = vector.load %arg7[%c0_16, %c0_17] : memref<8x4xf32, #tpu.memory_space<vmem>>, vector<8x4xf32>
    tpu.vector_store %arg7[%c0_16, %c0_17], %27 {strides = array<i32>} : memref<8x4xf32, #tpu.memory_space<vmem>>, vector<8x4xf32>,
    return
  }
  func.func @transform_0(%arg0: i32) -> (i32, i32) {
    %c0_i32 = arith.constant 0 : i32
    %c0_i32_0 = arith.constant 0 : i32
    return %arg0, %c0_i32 : i32, i32
  }
  func.func @transform_1(%arg0: i32) -> (i32, i32) {
    %c0_i32 = arith.constant 0 : i32
    %c0_i32_0 = arith.constant 0 : i32
    %c0_i32_1 = arith.constant 0 : i32
    return %c0_i32, %c0_i32_0 : i32, i32
  }
  func.func @transform_2(%arg0: i32) -> (i32, i32) {
    %c0_i32 = arith.constant 0 : i32
    %c0_i32_0 = arith.constant 0 : i32
    %c0_i32_1 = arith.constant 0 : i32
    return %c0_i32, %c0_i32_0 : i32, i32
  }
  func.func @transform_3(%arg0: i32) -> (i32, i32) {
    %c0_i32 = arith.constant 0 : i32
    %c0_i32_0 = arith.constant 0 : i32
    %c0_i32_1 = arith.constant 0 : i32
    return %c0_i32, %c0_i32_0 : i32, i32
  }
  func.func @transform_4(%arg0: i32) -> (i32, i32) {
    %c0_i32 = arith.constant 0 : i32
    %c0_i32_0 = arith.constant 0 : i32
    %c0_i32_1 = arith.constant 0 : i32
    return %c0_i32, %c0_i32_0 : i32, i32
  }
  func.func @transform_5(%arg0: i32) -> (i32, i32) {
    %c0_i32 = arith.constant 0 : i32
    %c0_i32_0 = arith.constant 0 : i32
    return %arg0, %c0_i32 : i32, i32
  }
  func.func @transform_6(%arg0: i32) -> (i32, i32) {
    %c0_i32 = arith.constant 0 : i32
    %c0_i32_0 = arith.constant 0 : i32
    return %arg0, %c0_i32 : i32, i32
  }
}

</mosaic_0001>

<bundles_post_ra>
// kernel: tpu_custom_call.1
= control target key start
LH: loop header
LB: loop body
LE: loop exit
PB: predicated region body
PF: predicated region fallthrough
CT: control target
= control target key end

     0   :  { %s696_s21 = smov 0   ;;  %s782_s0 = inlined_call_operand.vmem [shape: f32[16,8], index: 0, kind: input, shape index: {}]   ;;  %s783_s1 = inlined_call_operand.vmem [shape: f32[8,128], index: 1, kind: input, shape index: {}]   ;;  %s784_s2 = inlined_call_operand.vmem [shape: f32[1,128], index: 2, kind: input, shape index: {}]   ;;  %s785_s3 = inlined_call_operand.vmem [shape: f32[128,4], index: 3, kind: input, shape index: {}]   ;;  %s786_s4 = inlined_call_operand.vmem [shape: f32[1,4], index: 4, kind: input, shape index: {}]   ;;  %s787_s5 = inlined_call_operand.vmem [shape: f32[16,4], index: 5, kind: output, shape index: {0}]   ;;  %s788_s6 = inlined_call_operand.vmem [shape: f32[16,4], index: 6, kind: output, shape index: {1}]  }
   0x1 LB: > { %s537_s22 = sadd.s32 4294967295, %s656_s21   ;;  %p541_p0 = scmp.ge.s32.totalorder %s656_s21, 1  ;;  %s656_s21 = sphi %s696_s21, %s17_s21  }
   0x2   : > { %p214_p1 = scmp.lt.s32.totalorder %s656_s21, 3 }
   0x4   : > { %p215_p2 = pnand %p541_p0, %p214_p1 }
   0x5   : > { %v259_v0 = vld [vmem:[%s783_s1] sm:$0xff] (!%p215_p2)  ;;  %p246_p3 = scmp.lt.s32.totalorder (!%p215_p2), %s537_s22, 1  ;;  %v658_v1 = vmov (!%p215_p2), 0.0   ;;  %vm659_vm0 = vmmov (!%p215_p2), 0   ;;  %v343_v3 = vld [vmem:[%s785_s3 + $0x8] sm:$0xff] (!%p215_p2)  ;;  %v344_v4 = vld [vmem:[%s785_s3 + $0x10] sm:$0xff] (!%p215_p2) }
   0x6   : > { %218 = sbr.rel (%p215_p2) target bundleno = 764 (0x2fc), region = 40  ;;  %569 = vmatprep.subr.mxu0 (!%p215_p2), %v658_v1  ;;  %571 = vmatprep.mubr.msk.f32.mxu0 (!%p215_p2), %vm659_vm0, %v658_v1  ;;  %v342_v2 = vld [vmem:[%s785_s3] sm:$0xff] (!%p215_p2)  ;;  %v660_v5 = vmov (!%p215_p2), 0.0|0.0   ;;  %v345_v7 = vld [vmem:[%s785_s3 + $0x18] sm:$0xff] (!%p215_p2)  ;;  %vm267_vm1 = vcmask (!%p215_p2), 64512   ;;  %v347_v10 = vld [vmem:[%s785_s3 + $0x28] sm:$0xff] (!%p215_p2) }
   0x7   : > { %570 = vmatpush3.msra.mxu0 (!%p215_p2), %v259_v0  ;;  %609 = vmatprep.subr.bf16.mxu1 (!%p215_p2), %v660_v5  ;;  %v610_v6 = vpack.c.bf16 (!%p215_p2), %v343_v3, %v342_v2  ;;  %v613_v8 = vpack.c.bf16 (!%p215_p2), %v345_v7, %v344_v4  ;;  %v346_v9 = vld [vmem:[%s785_s3 + $0x20] sm:$0xff] (!%p215_p2)  ;;  %v348_v13 = vld [vmem:[%s785_s3 + $0x30] sm:$0xff] (!%p215_p2)  ;;  %v349_v14 = vld [vmem:[%s785_s3 + $0x38] sm:$0xff] (!%p215_p2)  ;;  %vm435_vm2 = vcmask (!%p215_p2), 31744  }
   0x8   : > { %606 = vmatprep.mubr.msk.f32.mxu1 (!%p215_p2), %vm659_vm0, %v658_v1  ;;  %v616_v12 = vpack.c.bf16 (!%p215_p2), %v347_v10, %v346_v9  ;;  %v619_v15 = vpack.c.bf16 (!%p215_p2), %v349_v14, %v348_v13  ;;  %v350_v16 = vld [vmem:[%s785_s3 + $0x40] sm:$0xff] (!%p215_p2)  ;;  %v351_v17 = vld [vmem:[%s785_s3 + $0x48] sm:$0xff] (!%p215_p2)  ;;  %v352_v19 = vld [vmem:[%s785_s3 + $0x50] sm:$0xff] (!%p215_p2) }
   0x9   : > { %611 = vmatpush3.bf16.msra.mxu1 (!%p215_p2), %v610_v6  ;;  %v622_v18 = vpack.c.bf16 (!%p215_p2), %v351_v17, %v350_v16  ;;  %v353_v20 = vld [vmem:[%s785_s3 + $0x58] sm:$0xff] (!%p215_p2)  ;;  %v354_v22 = vld [vmem:[%s785_s3 + $0x60] sm:$0xff] (!%p215_p2)  ;;  %v355_v23 = vld [vmem:[%s785_s3 + $0x68] sm:$0xff] (!%p215_p2) }
   0xa   : > { %612 = vmatprep.subr.bf16.mxu1 (!%p215_p2), %v660_v5  ;;  %v625_v21 = vpack.c.bf16 (!%p215_p2), %v353_v20, %v352_v19  ;;  %v628_v24 = vpack.c.bf16 (!%p215_p2), %v355_v23, %v354_v22  ;;  %v356_v25 = vld [vmem:[%s785_s3 + $0x70] sm:$0xff] (!%p215_p2)  ;;  %v357_v26 = vld [vmem:[%s785_s3 + $0x78] sm:$0xff] (!%p215_p2)  ;;  %v545_v28 = vld [vmem:[%s784_s2] ss:$0 sm:$0xff] (!%p215_p2) }
   0xb   : > { %v631_v27 = vpack.c.bf16 (!%p215_p2), %v357_v26, %v356_v25  ;;  %v547_v33 = vld [vmem:[%s786_s4] ss:$0 sm:$0xff] (!%p215_p2) }
   0xd   : > { %s790_s22 = smov (!%p246_p3, %s537_s22), 1  ;;  %614 = vmatpush3.bf16.msra.mxu1 %v613_v8 }
   0xe   : > { %s719_s9 = sshll.u32 %s790_s22, 3  ;;  %615 = vmatprep.subr.bf16.mxu1 %v660_v5 }
   0xf   : > { %s249_s12 = scalar_lea.vmem %s782_s0, %s719_s9  ;;  %s257_s22 = scalar_lea.vmem %s788_s6, %s719_s9 }
  0x10   : > { %v258_v11 = vld [vmem:[%s249_s12] sm:$0xff]  ;;  %s253_s25 = scalar_lea.vmem %s787_s5, %s719_s9 }
  0x11   : > { %572 = vmatmul.mubr.msk.f32.vlgmr.msra.gmra.mrb[0].mxu0 %vm267_vm1, %v258_v11  ;;  %617 = vmatpush3.bf16.msra.mxu1 %v616_v12 }
  0x12   : > { %618 = vmatprep.subr.bf16.mxu1 %v660_v5 }
  0x15   : > { %620 = vmatpush3.bf16.msra.mxu1 %v619_v15 }
  0x16   : > { %621 = vmatprep.subr.bf16.mxu1 %v660_v5 }
  0x19   : > { %623 = vmatpush3.bf16.msra.mxu1 %v622_v18 }
  0x1a   : > { %624 = vmatprep.subr.bf16.mxu1 %v660_v5 }
  0x1d   : > { %626 = vmatpush3.bf16.msra.mxu1 %v625_v21 }
  0x1e   : > { %627 = vmatprep.subr.bf16.mxu1 %v660_v5 }
  0x21   : > { %629 = vmatpush3.bf16.msra.mxu1 %v628_v24 }
  0x22   : > { %630 = vmatprep.subr.bf16.mxu1 %v660_v5 }
  0x25   : > { %632 = vmatpush3.bf16.msra.mxu1 %v631_v27 }
  0xe4   : > { %v337_v29 = vpop.f32.mrb[0].mxu0 }
  0xe5   : > { %v338_v30 = vadd.f32 %v545_v28, %v337_v29  ;;  %v573_v31 = vpop.f32.mrb[1].mxu0 }
  0xe7   : > { %v341_v32 = vmax.f32 %v338_v30, 0.0 }
  0xe9   : > { %607 = vmatmul.mubr.f32.vlgmr.msra.gmra.mrb[0].mxu1 %v341_v32 }
 0x1bc   : > { %v431_v34 = vpop.f32.mrb[0].mxu1 }
 0x1bd   : > { %v432_v35 = vadd.f32 %v547_v33, %v431_v34  ;;  %v608_v36 = vpop.f32.mrb[1].mxu1 }
 0x1bf   : > { %v436_v37 = vsel %vm435_vm2, %v432_v35, -inf }
 0x1c0   : > { %437 = vmax.xlane.f32.xlu0 %v436_v37 }
 0x24d   : > { %v438_v38 = vpop.xlane.xlu0 %437 }
 0x24e   : > { %v439_v39 = vsub.f32 %v432_v35, %v438_v38 }
 0x250   : > { %v440_v40 = vmul.f32 1.442695, %v439_v39 }
 0x252   : > { %644 = vpow2.f32 %v440_v40 }
 0x25c   : > { %v645_v41 = vpop.eup %644 }
 0x25d   : > { %v442_v42 = vsel %vm435_vm2, %v645_v41, 0.0 }
 0x25e   : > { %443 = vadd.xlane.f32.xlu0 %v442_v42 }
 0x2eb   : > { %v444_v43 = vpop.xlane.xlu0 %443 }
 0x2ec   : > { %646 = vlog2.f32 %v444_v43 }
 0x2ed   : > { %648 = vrcp.f32 %v444_v43 }
 0x2f6   : > { %v647_v44 = vpop.eup %646 }
 0x2f7   : > { %v649_v45 = vpop.eup %648  ;;  %v446_v46 = vmul.f32 0.6931472, %v647_v44 }
 0x2f8   : > { %v451_v47 = vmul.f32 %v649_v45, %v645_v41 }
 0x2f9   : > { %v447_v48 = vsub.f32 %v439_v39, %v446_v46 }
 0x2fa   : > { %452 = vst.msk [vmem:[%s257_s22] sm:$0xff] %vm435_vm2, %v451_v47 }
 0x2fb   : > { %448 = vst.msk [vmem:[%s253_s25] sm:$0xff] %vm435_vm2, %v447_v48 }
 0x2fc PF: > { %s17_s21 = sadd.s32 1, %s656_s21  }
 0x2fd   : > { %p14_p4 = scmp.ge.s32.totalorder %s17_s21, 4  }
 0x2ff   :  { %16 = sbr.rel (!%p14_p4) target bundleno = 1 (0x1), region = 82 }

</bundles_post_ra>
